<compile_context>
chip_gen: v5e
topology: v5e:2x2
jax: 0.10.0
libtpu: 0.0.40
codegen_flags: <defaults>
</compile_context>

<pallas_src>
import math
import functools

import jax
import jax.numpy as jnp
from jax.experimental import pallas as pl
from jax.experimental.pallas import tpu as pltpu


# -----------------------------------------------------------------------------
# Fused scaled-dot-product attention kernel
# -----------------------------------------------------------------------------
def _sdpa_kernel(q_ref, k_ref, v_ref, o_ref, *, scale):
    q = q_ref[...]                                   # (B, TQ, Dk) operand dtype
    k = k_ref[...]                                   # (B, Lk, Dk)
    v = v_ref[...]                                   # (B, Lk, Dv)

    # scores in f32 regardless of operand dtype (MXU accumulates f32)
    s = jnp.einsum('bqd,bkd->bqk', q, k,
                   preferred_element_type=jnp.float32) * scale     # (B, TQ, Lk)

    # numerically-stable softmax over the last axis (f32 elementwise)
    s = s - jnp.max(s, axis=-1, keepdims=True)
    p = jnp.exp(s)
    p = p * pl.reciprocal(jnp.sum(p, axis=-1, keepdims=True), approx=True)

    # weighted sum; feed the MXU in v's dtype, accumulate f32
    o = jnp.einsum('bqk,bkd->bqd', p.astype(v.dtype), v,
                   preferred_element_type=jnp.float32)             # (B, TQ, Dv)
    o_ref[...] = o.astype(o_ref.dtype)


def scaled_dot_product_attention(q, k, v, d_k=None, *, tq=None):
    """softmax(q @ k^T / sqrt(d_k)) @ v  (dropout = identity, eval mode).

    q: (..., Lq, Dk), k: (..., Lk, Dk), v: (..., Lk, Dv) — any leading batch
    dims (they are flattened and handled in a single grid step).
    """
    assert q.shape[:-2] == k.shape[:-2] == v.shape[:-2], "batch dims must match"
    *batch, Lq, Dk = q.shape
    Lk = k.shape[-2]
    Dv = v.shape[-1]
    assert k.shape[-1] == Dk and v.shape[-2] == Lk

    if d_k is None:
        d_k = Dk
    scale = 1.0 / math.sqrt(d_k)

    B = math.prod(batch) if batch else 1
    q3 = q.reshape(B, Lq, Dk)
    k3 = k.reshape(B, Lk, Dk)
    v3 = v.reshape(B, Lk, Dv)

    # Query tiling only when blocks stay (8,128)-aligned; otherwise one step.
    if (tq is None or tq <= 0 or Lq % tq or tq % 8 or Dk % 128 or Dv % 128):
        tq = Lq
    n_q = Lq // tq

    out = pl.pallas_call(
        functools.partial(_sdpa_kernel, scale=scale),
        out_shape=jax.ShapeDtypeStruct((B, Lq, Dv), q.dtype),
        grid_spec=pltpu.PrefetchScalarGridSpec(
            num_scalar_prefetch=0,
            grid=(n_q,),
            in_specs=[
                pl.BlockSpec((B, tq, Dk), lambda i: (0, i, 0)),   # query tile
                pl.BlockSpec((B, Lk, Dk), lambda i: (0, 0, 0)),   # full keys
                pl.BlockSpec((B, Lk, Dv), lambda i: (0, 0, 0)),   # full values
            ],
            out_specs=pl.BlockSpec((B, tq, Dv), lambda i: (0, i, 0)),
        ),
        compiler_params=pltpu.CompilerParams(
            dimension_semantics=("parallel",)),
    )(q3, k3, v3)

    return out.reshape(*batch, Lq, Dv) if batch else out.reshape(Lq, Dv)


# -----------------------------------------------------------------------------
# Smoke test
# -----------------------------------------------------------------------------
if __name__ == "__main__":
    key = jax.random.PRNGKey(0)
    kq, kk, kv = jax.random.split(key, 3)

    B, H, L, D = 2, 4, 8, 32            # batch, heads, seq, d_k
    q = jax.random.normal(kq, (B, H, L, D), jnp.float32)
    k = jax.random.normal(kk, (B, H, L, D), jnp.float32)
    v = jax.random.normal(kv, (B, H, L, D), jnp.float32)

    fwd = jax.jit(functools.partial(scaled_dot_product_attention, d_k=D))
    out = jax.block_until_ready(fwd(q, k, v))
    assert out.shape == (B, H, L, D) and out.dtype == jnp.float32

    # pure-JAX reference (dropout = identity at eval)
    s_ref = jnp.einsum('bhqd,bhkd->bhqk', q, k) / math.sqrt(D)
    ref = jnp.einsum('bhqk,bhkd->bhqd', jax.nn.softmax(s_ref, axis=-1), v)
    err = float(jnp.max(jnp.abs(out - ref)))
    assert err < 2e-2, f"max abs err {err}"

    # bf16 operand path (MXU-native inputs, f32 softmax/accumulation in-kernel)
    out_bf16 = jax.block_until_ready(
        fwd(q.astype(jnp.bfloat16), k.astype(jnp.bfloat16), v.astype(jnp.bfloat16)))
    assert out_bf16.shape == (B, H, L, D) and out_bf16.dtype == jnp.bfloat16

    print("KERNEL_OK")
</pallas_src>

<mosaic_0001>
module attributes {stable_mosaic.version = 11 : i64} {
  func.func @_sdpa_kernel(%arg0: i32, %arg1: memref<8x8x32xf32, #tpu.memory_space<vmem>>, %arg2: memref<8x8x32xf32, #tpu.memory_space<vmem>>, %arg3: memref<8x8x32xf32, #tpu.memory_space<vmem>>, %arg4: memref<8x8x32xf32, #tpu.memory_space<vmem>>) attributes {dimension_semantics = [#tpu.dimension_semantics<parallel>], iteration_bounds = array<i64: 1>, scalar_prefetch = 0 : i64, scratch_operands = 0 : i64, tpu.core_type = #tpu.core_type<tc>, window_params = [{transform_indices = @transform_0, window_bounds = array<i64: 8, 8, 32>}, {pipeline_mode = #tpu.pipeline_mode<synchronous>, transform_indices = @transform_1, window_bounds = array<i64: 8, 8, 32>}, {pipeline_mode = #tpu.pipeline_mode<synchronous>, transform_indices = @transform_2, window_bounds = array<i64: 8, 8, 32>}, {transform_indices = @transform_3, window_bounds = array<i64: 8, 8, 32>}]} {
    %c0 = arith.constant 0 : index
    %c0_0 = arith.constant 0 : index
    %c0_1 = arith.constant 0 : index
    %0 = vector.load %arg1[%c0, %c0_0, %c0_1] : memref<8x8x32xf32, #tpu.memory_space<vmem>>, vector<8x8x32xf32>
    %c0_2 = arith.constant 0 : index
    %c0_3 = arith.constant 0 : index
    %c0_4 = arith.constant 0 : index
    %1 = vector.load %arg2[%c0_2, %c0_3, %c0_4] : memref<8x8x32xf32, #tpu.memory_space<vmem>>, vector<8x8x32xf32>
    %c0_5 = arith.constant 0 : index
    %c0_6 = arith.constant 0 : index
    %c0_7 = arith.constant 0 : index
    %2 = vector.load %arg3[%c0_5, %c0_6, %c0_7] : memref<8x8x32xf32, #tpu.memory_space<vmem>>, vector<8x8x32xf32>
    "tpu.trace_start"() <{level = 10 : i32, message = "bqd,bkd->bqk"}> : () -> ()
    %cst = arith.constant dense<0.000000e+00> : vector<8x8x8xf32>
    %3 = tpu.matmul %0, %1, %cst {dimension_numbers = #tpu.dot_dimension_numbers<[2], [2], [1], [1], [0, 0, 0, 1, 1, 1], [0], [0]>} : vector<8x8x32xf32>, vector<8x8x32xf32>, vector<8x8x8xf32> -> vector<8x8x8xf32>
    "tpu.trace_stop"() : () -> ()
    %cst_8 = arith.constant 0.176776692 : f32
    %4 = vector.broadcast %cst_8 : f32 to vector<8x8x8xf32>
    %5 = arith.mulf %3, %4 : vector<8x8x8xf32>
    %cst_9 = arith.constant dense<0xFF800000> : vector<8x8xf32>
    %6 = vector.multi_reduction <maximumf>, %5, %cst_9 [2] : vector<8x8x8xf32> to vector<8x8xf32>
    %7 = vector.shape_cast %6 : vector<8x8xf32> to vector<8x8x1xf32>
    %8 = vector.broadcast %7 : vector<8x8x1xf32> to vector<8x8x8xf32>
    %9 = arith.subf %5, %8 : vector<8x8x8xf32>
    %10 = math.exp %9 : vector<8x8x8xf32>
    %cst_10 = arith.constant dense<0.000000e+00> : vector<8x8xf32>
    %11 = vector.multi_reduction <add>, %10, %cst_10 [2] : vector<8x8x8xf32> to vector<8x8xf32>
    %12 = vector.shape_cast %11 : vector<8x8xf32> to vector<8x8x1xf32>
    %13 = tpu.reciprocal %12 {approx = true} : vector<8x8x1xf32> -> vector<8x8x1xf32>
    %14 = vector.broadcast %13 : vector<8x8x1xf32> to vector<8x8x8xf32>
    %15 = arith.mulf %10, %14 : vector<8x8x8xf32>
    "tpu.trace_start"() <{level = 10 : i32, message = "bqk,bkd->bqd"}> : () -> ()
    %cst_11 = arith.constant dense<0.000000e+00> : vector<8x8x32xf32>
    %16 = tpu.matmul %15, %2, %cst_11 {dimension_numbers = #tpu.dot_dimension_numbers<[2], [1], [1], [2], [0, 0, 0, 1, 1, 2], [0], [0]>} : vector<8x8x8xf32>, vector<8x8x32xf32>, vector<8x8x32xf32> -> vector<8x8x32xf32>
    "tpu.trace_stop"() : () -> ()
    %c0_12 = arith.constant 0 : index
    %c0_13 = arith.constant 0 : index
    %c0_14 = arith.constant 0 : index
    %17 = vector.load %arg4[%c0_12, %c0_13, %c0_14] : memref<8x8x32xf32, #tpu.memory_space<vmem>>, vector<8x8x32xf32>
    tpu.vector_store %arg4[%c0_12, %c0_13, %c0_14], %16 {strides = array<i32>} : memref<8x8x32xf32, #tpu.memory_space<vmem>>, vector<8x8x32xf32>,
    return
  }
  func.func @transform_0(%arg0: i32) -> (i32, i32, i32) {
    %c0_i32 = arith.constant 0 : i32
    %c0_i32_0 = arith.constant 0 : i32
    %c0_i32_1 = arith.constant 0 : i32
    return %c0_i32, %arg0, %c0_i32_0 : i32, i32, i32
  }
  func.func @transform_1(%arg0: i32) -> (i32, i32, i32) {
    %c0_i32 = arith.constant 0 : i32
    %c0_i32_0 = arith.constant 0 : i32
    %c0_i32_1 = arith.constant 0 : i32
    %c0_i32_2 = arith.constant 0 : i32
    return %c0_i32, %c0_i32_0, %c0_i32_1 : i32, i32, i32
  }
  func.func @transform_2(%arg0: i32) -> (i32, i32, i32) {
    %c0_i32 = arith.constant 0 : i32
    %c0_i32_0 = arith.constant 0 : i32
    %c0_i32_1 = arith.constant 0 : i32
    %c0_i32_2 = arith.constant 0 : i32
    return %c0_i32, %c0_i32_0, %c0_i32_1 : i32, i32, i32
  }
  func.func @transform_3(%arg0: i32) -> (i32, i32, i32) {
    %c0_i32 = arith.constant 0 : i32
    %c0_i32_0 = arith.constant 0 : i32
    %c0_i32_1 = arith.constant 0 : i32
    return %c0_i32, %arg0, %c0_i32_0 : i32, i32, i32
  }
}

</mosaic_0001>

<bundles_post_ra>
// kernel: scaled_dot_product_attention.1
= control target key start
LH: loop header
LB: loop body
LE: loop exit
PB: predicated region body
PF: predicated region fallthrough
CT: control target
= control target key end

     0   :  { %8 = vsyncpa [#allocation3], 0  ;;  %s874_s0 = inlined_call_operand.hbm [shape: f32[8,8,32], index: 0, kind: input, shape index: {}]   ;;  %s875_s1 = inlined_call_operand.hbm [shape: f32[8,8,32], index: 1, kind: input, shape index: {}]   ;;  %s876_s2 = inlined_call_operand.hbm [shape: f32[8,8,32], index: 2, kind: input, shape index: {}]   ;;  %s877_s3 = inlined_call_operand.hbm [shape: f32[8,8,32], index: 3, kind: output, shape index: {}]  }
   0x1   :  { %9 = vsyncpa [#allocation6], 0 }
   0x2   :  { %10 = vsyncpa [#allocation4], 0  ;;  %s28_s14 = sshll.u32 %s875_s1, 4  ;;  %s768_s15 = smov [#allocation5]   ;;  %s29_s14 = int_to_ptr.hbm [resolvable:$true] %s28_s14 }
   0x3   :  { %s30_s16 = sshll.u32 %s768_s15, 4  ;;  %s15_s19 = sshll.u32 %s874_s0, 4  ;;  %s31_s16 = int_to_ptr.vmem [resolvable:$true] %s30_s16  ;;  %s16_s19 = int_to_ptr.hbm [resolvable:$true] %s15_s19 }
   0x4   :  { %s769_s20 = smov 128   ;;  %s770_s21 = smov 8  }
   0x5   :  { %36 = dma.hbm_to_vmem [thread:$0]  %s29_s14, 1024, %s31_s16, [#allocation6], %s769_s20, %s769_s20, %s770_s21  }
   0x6   :  { %s771_s22 = smov [#allocation2]   ;;  %s41_s1 = sshll.u32 %s876_s2, 4  ;;  %s42_s1 = int_to_ptr.hbm [resolvable:$true] %s41_s1 }
   0x7   :  { %s17_s23 = sshll.u32 %s771_s22, 4  ;;  %s772_s0 = smov [#allocation7]   ;;  %s18_s23 = int_to_ptr.vmem [resolvable:$true] %s17_s23 }
   0x8   :  { %23 = dma.hbm_to_vmem [thread:$0]  %s16_s19, 1024, %s18_s23, [#allocation3], %s769_s20, %s769_s20, %s770_s21  }
   0x9   :  { %s43_s26 = sshll.u32 %s772_s0, 4  ;;  %s44_s26 = int_to_ptr.vmem [resolvable:$true] %s43_s26 }
   0xa   :  { %49 = dma.hbm_to_vmem [thread:$0]  %s42_s1, 1024, %s44_s26, [#allocation6], %s769_s20, %s769_s20, %s770_s21  }
   0xb   :  { %762 = dma.done.wait [#allocation3], 1024  }
   0xc   :  { %763 = vsyncadd [#allocation3], 4294966272 }
   0xd   :  { %764 = dma.done.wait [#allocation6], 2048  }
   0xe   :  { %765 = vsyncadd [#allocation6], 4294965248  ;;  %vm86_vm0 = vcmask 261120   ;;  %v70_v0 = vld [vmem:[#allocation5] sm:$0xff]  ;;  %v72_v1 = vld [vmem:[#allocation5 + $0x10] sm:$0xff]  ;;  %vm303_vm1 = vcmask 64512  }
   0xf   :  { %v62_v2 = vld [vmem:[#allocation2] sm:$0xff]  ;;  %604 = vmatpush.xpose.msk.msra.mxu0 %vm86_vm0, %v70_v0  ;;  %608 = vmatpush.xpose.msk.msra.mxu2 %vm86_vm0, %v72_v1  ;;  %v64_v3 = vld [vmem:[#allocation2 + $0x10] sm:$0xff]  ;;  %v71_v5 = vld [vmem:[#allocation5 + $0x8] sm:$0xff]  ;;  %s773_s2 = smov [#allocation8]   ;;  %s590_s30 = sshll.u32 %s877_s3, 4  ;;  %s591_s30 = int_to_ptr.hbm [resolvable:$true] %s590_s30 }
  0x10   :  { %v76_v4 = vld [vmem:[#allocation5 + $0x30] sm:$0xff]  ;;  %606 = vmatpush.xpose.msk.msra.mxu1 %vm86_vm0, %v71_v5  ;;  %v73_v6 = vld [vmem:[#allocation5 + $0x18] sm:$0xff]  ;;  %v63_v7 = vld [vmem:[#allocation2 + $0x8] sm:$0xff]  ;;  %s588_s27 = sshll.u32 %s773_s2, 4  ;;  %s589_s27 = int_to_ptr.vmem [resolvable:$true] %s588_s27 }
  0x11   :  { %610 = vmatpush.xpose.msk.msra.mxu3 %vm86_vm0, %v73_v6  ;;  %v65_v8 = vld [vmem:[#allocation2 + $0x18] sm:$0xff]  ;;  %v75_v10 = vld [vmem:[#allocation5 + $0x28] sm:$0xff]  ;;  %v74_v11 = vld [vmem:[#allocation5 + $0x20] sm:$0xff] }
  0x12   :  { %v77_v9 = vld [vmem:[#allocation5 + $0x38] sm:$0xff]  ;;  %605 = vmatmul.msk.f32.vlgmr.msra.gmra.mxu0 %vm86_vm0, %v62_v2  ;;  %609 = vmatmul.msk.f32.vlgmr.msra.gmra.mxu2 %vm86_vm0, %v64_v3  ;;  %v68_v12 = vld [vmem:[#allocation2 + $0x30] sm:$0xff]  ;;  %v66_v13 = vld [vmem:[#allocation2 + $0x20] sm:$0xff] }
  0x13   :  { %616 = vmatpush.xpose.msk.msrb.mxu2 %vm86_vm0, %v76_v4  ;;  %607 = vmatmul.msk.f32.vlgmr.msra.gmra.mxu1 %vm86_vm0, %v63_v7  ;;  %v67_v14 = vld [vmem:[#allocation2 + $0x28] sm:$0xff]  ;;  %v69_v15 = vld [vmem:[#allocation2 + $0x38] sm:$0xff] }
  0x14   :  { %611 = vmatmul.msk.f32.vlgmr.msra.gmra.mxu3 %vm86_vm0, %v65_v8  ;;  %614 = vmatpush.xpose.msk.msrb.mxu1 %vm86_vm0, %v75_v10 }
  0x15   :  { %618 = vmatpush.xpose.msk.msrb.mxu3 %vm86_vm0, %v77_v9  ;;  %612 = vmatpush.xpose.msk.msrb.mxu0 %vm86_vm0, %v74_v11 }
  0x1a   :  { %617 = vmatmul.msk.f32.vlgmr.msrb.gmra.mxu2 %vm86_vm0, %v68_v12  ;;  %613 = vmatmul.msk.f32.vlgmr.msrb.gmra.mxu0 %vm86_vm0, %v66_v13 }
  0x1b   :  { %615 = vmatmul.msk.f32.vlgmr.msrb.gmra.mxu1 %vm86_vm0, %v67_v14 }
  0x1c   :  { %619 = vmatmul.msk.f32.vlgmr.msrb.gmra.mxu3 %vm86_vm0, %v69_v15 }
  0x8f   :  { %v110_v16 = vpop.f32.mrf.mxu0 }
  0x90   :  { %v295_v17 = vmul.f32 0.17677669, %v110_v16  ;;  %v136_v18 = vpop.f32.mrf.mxu1  ;;  %v78_v16 = vld [vmem:[#allocation7] sm:$0xff] }
  0x91   :  { %v296_v20 = vmul.f32 0.17677669, %v136_v18  ;;  %410 = vmatpush.msra.mxu0 %v78_v16  ;;  %v81_v18 = vld [vmem:[#allocation7 + $0x18] sm:$0xff] }
  0x92   :  { %v304_v19 = vsel %vm303_vm1, %v295_v17, -inf  ;;  %479 = vmatpush.msra.mxu3 %v81_v18 }
  0x93   :  { %305 = vmax.xlane.f32.xlu1 %v304_v19  ;;  %v307_v25 = vsel %vm303_vm1, %v296_v20, -inf  ;;  %v79_v19 = vld [vmem:[#allocation7 + $0x8] sm:$0xff] }
  0x94   :  { %433 = vmatpush.msra.mxu1 %v79_v19 }
  0x95   :  { %v162_v21 = vpop.f32.mrf.mxu2 }
  0x96   :  { %v297_v22 = vmul.f32 0.17677669, %v162_v21  ;;  %v84_v21 = vld [vmem:[#allocation7 + $0x30] sm:$0xff] }
  0x97   :  { %v188_v23 = vpop.f32.mrf.mxu3  ;;  %v214_v32 = vpop.f32.mrf.mxu0 }
  0x98   :  { %v310_v24 = vsel %vm303_vm1, %v297_v22, -inf  ;;  %v240_v26 = vpop.f32.mrf.mxu1  ;;  %v298_v27 = vmul.f32 0.17677669, %v188_v23  ;;  %v299_v36 = vmul.f32 0.17677669, %v214_v32  ;;  %v82_v23 = vld [vmem:[#allocation7 + $0x20] sm:$0xff] }
  0x99   :  { %311 = vmax.xlane.f32.xlu0 %v310_v24  ;;  %v300_v28 = vmul.f32 0.17677669, %v240_v26  ;;  %502 = vmatpush.msrb.mxu0 %v82_v23 }
  0x9a   :  { %v313_v31 = vsel %vm303_vm1, %v298_v27, -inf  ;;  %v316_v39 = vsel %vm303_vm1, %v299_v36, -inf }
  0x9b   :  { %308 = vmax.xlane.f32.xlu1 %v307_v25  ;;  %v319_v35 = vsel %vm303_vm1, %v300_v28, -inf  ;;  %v83_v25 = vld [vmem:[#allocation7 + $0x28] sm:$0xff] }
  0x9c   :  { %525 = vmatpush.msrb.mxu1 %v83_v25 }
  0x9d   :  { %v266_v29 = vpop.f32.mrf.mxu2 }
  0x9e   :  { %v301_v30 = vmul.f32 0.17677669, %v266_v29 }
  0x9f   :  { %v292_v33 = vpop.f32.mrf.mxu3 }
  0xa0   :  { %v322_v34 = vsel %vm303_vm1, %v301_v30, -inf  ;;  %v302_v37 = vmul.f32 0.17677669, %v292_v33 }
  0xa1   :  { %314 = vmax.xlane.f32.xlu0 %v313_v31  ;;  %323 = vmax.xlane.f32.xlu2 %v322_v34 }
  0xa2   :  { %v325_v38 = vsel %vm303_vm1, %v302_v37, -inf }
  0xa3   :  { %320 = vmax.xlane.f32.xlu1 %v319_v35 }
  0xa9   :  { %326 = vmax.xlane.f32.xlu2 %v325_v38  ;;  %317 = vmax.xlane.f32.xlu0 %v316_v39 }
 0x106   :  { %v306_v40 = vpop.xlane.xlu1 %305 }
 0x107   :  { %v328_v41 = vsub.f32 %v295_v17, %v306_v40  ;;  %v80_v17 = vld [vmem:[#allocation7 + $0x10] sm:$0xff] }
 0x108   :  { %456 = vmatpush.msra.mxu2 %v80_v17 }
 0x109   :  { %v336_v42 = vmul.f32 1.442695, %v328_v41 }
 0x10a   :  { %548 = vmatpush.msrb.mxu2 %v84_v21 }
 0x10b   :  { %634 = vpow2.f32 %v336_v42 }
 0x10c   :  { %v312_v43 = vpop.xlane.xlu0 %311 }
 0x10d   :  { %v330_v44 = vsub.f32 %v297_v22, %v312_v43  ;;  %v85_v22 = vld [vmem:[#allocation7 + $0x38] sm:$0xff] }
 0x10e   :  { %v309_v45 = vpop.xlane.xlu1 %308  ;;  %571 = vmatpush.msrb.mxu3 %v85_v22 }
 0x10f   :  { %v340_v46 = vmul.f32 1.442695, %v330_v44  ;;  %v329_v47 = vsub.f32 %v296_v20, %v309_v45 }
 0x111   :  { %v836_v48 = vpop.eup %634  ;;  %636 = vpow2.f32 %v340_v46  ;;  %v338_v50 = vmul.f32 1.442695, %v329_v47 }
 0x112   :  { %v352_v49 = vsel %vm303_vm1, %v836_v48, 0.0 }
 0x113   :  { %353 = vadd.xlane.f32.xlu1 %v352_v49  ;;  %638 = vpow2.f32 %v338_v50 }
 0x114   :  { %v315_v51 = vpop.xlane.xlu0 %314  ;;  %v324_v52 = vpop.xlane.xlu2 %323 }
 0x115   :  { %v331_v53 = vsub.f32 %v298_v27, %v315_v51  ;;  %v334_v56 = vsub.f32 %v301_v30, %v324_v52 }
 0x116   :  { %v321_v59 = vpop.xlane.xlu1 %320 }
 0x117   :  { %v840_v54 = vpop.eup %636  ;;  %v342_v55 = vmul.f32 1.442695, %v331_v53  ;;  %v348_v58 = vmul.f32 1.442695, %v334_v56  ;;  %v333_v2 = vsub.f32 %v300_v28, %v321_v59 }
 0x118   :  { %v358_v57 = vsel %vm303_vm1, %v840_v54, 0.0 }
 0x119   :  { %640 = vpow2.f32 %v342_v55  ;;  %359 = vadd.xlane.f32.xlu2 %v358_v57  ;;  %v639_v62 = vpop.eup %638  ;;  %v346_v7 = vmul.f32 1.442695, %v333_v2 }
 0x11a   :  { %642 = vpow2.f32 %v348_v58  ;;  %v355_v5 = vsel %vm303_vm1, %v639_v62, 0.0 }
 0x11c   :  { %v327_v60 = vpop.xlane.xlu2 %326  ;;  %v318_v61 = vpop.xlane.xlu0 %317 }
 0x11d   :  { %v335_v63 = vsub.f32 %v302_v37, %v327_v60  ;;  %v332_v0 = vsub.f32 %v299_v36, %v318_v61 }
 0x11f   :  { %v641_v1 = vpop.eup %640  ;;  %v350_v3 = vmul.f32 1.442695, %v335_v63  ;;  %v344_v4 = vmul.f32 1.442695, %v332_v0 }
 0x120   :  { %v361_v6 = vsel %vm303_vm1, %v641_v1, 0.0  ;;  %v643_v8 = vpop.eup %642 }
 0x121   :  { %644 = vpow2.f32 %v350_v3  ;;  %356 = vadd.xlane.f32.xlu2 %v355_v5  ;;  %362 = vadd.xlane.f32.xlu0 %v361_v6  ;;  %v370_v12 = vsel %vm303_vm1, %v643_v8, 0.0 }
 0x122   :  { %646 = vpow2.f32 %v344_v4 }
 0x123   :  { %648 = vpow2.f32 %v346_v7 }
 0x127   :  { %v645_v9 = vpop.eup %644 }
 0x128   :  { %v647_v10 = vpop.eup %646  ;;  %v373_v11 = vsel %vm303_vm1, %v645_v9, 0.0 }
 0x129   :  { %374 = vadd.xlane.f32.xlu1 %v373_v11  ;;  %371 = vadd.xlane.f32.xlu0 %v370_v12  ;;  %v364_v13 = vsel %vm303_vm1, %v647_v10, 0.0  ;;  %v649_v14 = vpop.eup %648 }
 0x12a   :  { %365 = vadd.xlane.f32.xlu2 %v364_v13  ;;  %v367_v15 = vsel %vm303_vm1, %v649_v14, 0.0 }
 0x131   :  { %368 = vadd.xlane.f32.xlu0 %v367_v15 }
 0x186   :  { %v354_v20 = vpop.xlane.xlu1 %353 }
 0x187   :  { %650 = vrcp.f32 %v354_v20 }
 0x18c   :  { %v360_v24 = vpop.xlane.xlu2 %359 }
 0x18d   :  { %v651_v26 = vpop.eup %650  ;;  %652 = vrcp.f32 %v360_v24 }
 0x18e   :  { %v384_v27 = vmul.f32 %v651_v26, %v836_v48 }
 0x190   :  { %620 = vmatmul.msk.f32.vlgmr.msra.gmra.mxu0 %vm303_vm1, %v384_v27 }
 0x193   :  { %v653_v28 = vpop.eup %652 }
 0x194   :  { %v386_v29 = vmul.f32 %v653_v28, %v840_v54  ;;  %v357_v30 = vpop.xlane.xlu2 %356  ;;  %v363_v31 = vpop.xlane.xlu0 %362 }
 0x195   :  { %654 = vrcp.f32 %v357_v30 }
 0x196   :  { %656 = vrcp.f32 %v363_v31  ;;  %622 = vmatmul.msk.f32.vlgmr.msra.gmra.mxu2 %vm303_vm1, %v386_v29 }
 0x19b   :  { %v655_v32 = vpop.eup %654 }
 0x19c   :  { %v657_v33 = vpop.eup %656  ;;  %v385_v34 = vmul.f32 %v655_v32, %v639_v62  ;;  %v375_v35 = vpop.xlane.xlu1 %374 }
 0x19d   :  { %v372_v36 = vpop.xlane.xlu0 %371  ;;  %v387_v37 = vmul.f32 %v657_v33, %v641_v1  ;;  %658 = vrcp.f32 %v375_v35  ;;  %v366_v38 = vpop.xlane.xlu2 %365 }
 0x19e   :  { %660 = vrcp.f32 %v366_v38  ;;  %621 = vmatmul.msk.f32.vlgmr.msra.gmra.mxu1 %vm303_vm1, %v385_v34 }
 0x19f   :  { %662 = vrcp.f32 %v372_v36  ;;  %623 = vmatmul.msk.f32.vlgmr.msra.gmra.mxu3 %vm303_vm1, %v387_v37 }
 0x1a3   :  { %v659_v39 = vpop.eup %658 }
 0x1a4   :  { %v661_v40 = vpop.eup %660  ;;  %v391_v41 = vmul.f32 %v659_v39, %v645_v9 }
 0x1a5   :  { %v369_v42 = vpop.xlane.xlu0 %368  ;;  %v663_v43 = vpop.eup %662  ;;  %v388_v44 = vmul.f32 %v661_v40, %v647_v10 }
 0x1a6   :  { %664 = vrcp.f32 %v369_v42  ;;  %v390_v45 = vmul.f32 %v663_v43, %v643_v8 }
 0x1a7   :  { %624 = vmatmul.msk.f32.vlgmr.msrb.gmra.mxu0 %vm303_vm1, %v388_v44  ;;  %627 = vmatmul.msk.f32.vlgmr.msrb.gmra.mxu3 %vm303_vm1, %v391_v41 }
 0x1a8   :  { %626 = vmatmul.msk.f32.vlgmr.msrb.gmra.mxu2 %vm303_vm1, %v390_v45 }
 0x1ac   :  { %v665_v46 = vpop.eup %664 }
 0x1ad   :  { %v389_v47 = vmul.f32 %v665_v46, %v649_v14 }
 0x1af   :  { %625 = vmatmul.msk.f32.vlgmr.msrb.gmra.mxu1 %vm303_vm1, %v389_v47 }
 0x20d   :  { %v412_v48 = vpop.f32.mrf.mxu0 }
 0x20e   :  { %576 = vst.msk [vmem:[#allocation8] sm:$0xff] %vm86_vm0, %v412_v48 }
 0x219   :  { %v458_v49 = vpop.f32.mrf.mxu2 }
 0x21a   :  { %578 = vst.msk [vmem:[#allocation8 + $0x10] sm:$0xff] %vm86_vm0, %v458_v49 }
 0x21b   :  { %v435_v50 = vpop.f32.mrf.mxu1 }
 0x21c   :  { %577 = vst.msk [vmem:[#allocation8 + $0x8] sm:$0xff] %vm86_vm0, %v435_v50 }
 0x222   :  { %v481_v51 = vpop.f32.mrf.mxu3 }
 0x223   :  { %579 = vst.msk [vmem:[#allocation8 + $0x18] sm:$0xff] %vm86_vm0, %v481_v51 }
 0x224   :  { %v504_v52 = vpop.f32.mrf.mxu0 }
 0x225   :  { %580 = vst.msk [vmem:[#allocation8 + $0x20] sm:$0xff] %vm86_vm0, %v504_v52 }
 0x22a   :  { %v573_v53 = vpop.f32.mrf.mxu3 }
 0x22b   :  { %v550_v54 = vpop.f32.mrf.mxu2  ;;  %583 = vst.msk [vmem:[#allocation8 + $0x38] sm:$0xff] %vm86_vm0, %v573_v53 }
 0x22c   :  { %v527_v55 = vpop.f32.mrf.mxu1  ;;  %582 = vst.msk [vmem:[#allocation8 + $0x30] sm:$0xff] %vm86_vm0, %v550_v54 }
 0x22d   :  { %581 = vst.msk [vmem:[#allocation8 + $0x28] sm:$0xff] %vm86_vm0, %v527_v55 }
 0x22e   :  { %596 = dma.vmem_to_hbm [thread:$0]  %s589_s27, 1024, %s591_s30, [#allocation4], %s769_s20, %s769_s20, %s770_s21  }
 0x22f   :  { %766 = dma.done.wait [#allocation4], 1024  }
 0x230   :  { %767 = vsyncadd [#allocation4], 4294966272 }
 0x231   :  { %601 = vsyncpa [#allocation3], 1 }
 0x232   :  { %602 = vsyncpa [#allocation6], 1 }
 0x233   :  { %603 = vsyncpa [#allocation4], 1 }

</bundles_post_ra>
